<compile_context>
chip_gen: v7x
topology: tpu7x:2x2x1
jax: 0.10.0
libtpu: 0.0.40
codegen_flags: <defaults>
</compile_context>

<pallas_src>
import math

import jax
import jax.numpy as jnp
from jax.experimental import pallas as pl
from jax.experimental.pallas import tpu as pltpu

EPS = 1e-5


# ----------------------------------------------------------------------------
# Kernel: fused (upsample x2 -> 3x3 conv) as one im2col matmul per row tile, plus
# per-tile per-channel sum / sum-of-squares of the pre-bias conv output.
# ----------------------------------------------------------------------------
def upconv_stats_kernel(x_ref, w_ref, y_ref, stats_ref):
    # x_ref:     (1, 1, TH+2, W+2, Cin)     bf16, original-resolution rows incl. halo
    # w_ref:     (9*Cin, 4*Cout)            bf16, upsample-folded weights (resident)
    # y_ref:     (1, 1, TH*W/P, P*4*Cout)   bf16, pixel+phase packed conv output (pre-bias)
    # stats_ref: (1, 1, 2, 4*Cout)          f32, per-tile [sum ; sum of squares]
    _, _, THp, Wp, Cin = x_ref.shape
    TH, W = THp - 2, Wp - 2
    HWt = TH * W
    C4 = w_ref.shape[1]
    P = y_ref.shape[3] // C4                    # pixels packed per stored row (static)

    xp = x_ref[0, 0]                            # (TH+2, W+2, Cin) bf16, loaded once

    # im2col at ORIGINAL resolution: one dx-window (3 concats), then 3 dy-shifts
    # (3 concats) instead of 9 narrow concats.  Columns ordered (dy, dx, cin).
    xw = jnp.concatenate([xp[:, dx:dx + W, :] for dx in range(3)], axis=-1)   # (TH+2, W, 3Cin)
    patches = jnp.concatenate(
        [xw[dy:dy + TH].reshape(HWt, 3 * Cin) for dy in range(3)], axis=-1)   # (HWt, 9Cin)

    # One MXU matmul: all 9 taps and all 4 upsample phases at once (f32 accumulation).
    acc = jnp.dot(patches, w_ref[...], preferred_element_type=jnp.float32)    # (HWt, 4*Cout)

    # Per-tile BatchNorm partial statistics on the f32 pre-bias accumulator.
    s = jnp.sum(acc, axis=0, keepdims=True)                                   # (1, 4*Cout)
    q = jnp.sum(acc * acc, axis=0, keepdims=True)                             # (1, 4*Cout)
    stats_ref[0, 0] = jnp.concatenate([s, q], axis=0)                         # (2, 4*Cout)

    # Lane-dense store: pack P consecutive pixels per row so the stored last dim is a
    # multiple of 128 lanes.  The row gather acc[k::P] is expressed as a tiny exact
    # 0/1-selection matmul (avoids unsupported sublane<->lane reshapes), then lane-concat.
    accb = acc.astype(jnp.bfloat16)
    if P > 1:
        g_idx = jax.lax.broadcasted_iota(jnp.int32, (HWt // P, HWt), 0)
        p_idx = jax.lax.broadcasted_iota(jnp.int32, (HWt // P, HWt), 1)
        pieces = []
        for k in range(P):                      # static, tiny (P <= 4 in practice)
            sel_k = jnp.where(p_idx == P * g_idx + k,
                              jnp.float32(1), jnp.float32(0)).astype(jnp.bfloat16)
            pieces.append(jnp.dot(sel_k, accb, preferred_element_type=jnp.float32))
        y_ref[0, 0] = jnp.concatenate(pieces, axis=-1).astype(jnp.bfloat16)
    else:
        y_ref[0, 0] = accb


def _pick_row_tile(H, W, Cin, Cout):
    """Rows per tile: at least 2 tiles when possible (pipeline depth / both v7x
    TensorCores even at N==1), shrunk until the per-step working set is modest."""
    def step_bytes(th):
        hwt = th * W
        x_blk = (th + 2) * (W + 2) * Cin * 2          # bf16
        patches = hwt * 9 * Cin * 2                   # bf16
        acc = hwt * 4 * Cout * 4                      # f32
        y_blk = hwt * 4 * Cout * 2                    # bf16
        return 2 * x_blk + patches + acc + 2 * y_blk  # in/out double-buffered

    th = H
    if H >= 8 and H % 2 == 0:
        th = H // 2
    while th % 2 == 0 and th > 1 and step_bytes(th) > 8 * 1024 * 1024:
        th //= 2
    return th


# ----------------------------------------------------------------------------
# Wrapper = up_conv.forward  (NCHW in, NCHW out)
# ----------------------------------------------------------------------------
@jax.jit
def up_conv_forward(x_nchw, w_oihw, b, gamma, beta):
    N, Cin, H, W = x_nchw.shape
    Cout = w_oihw.shape[0]
    OH, OW = 2 * H, 2 * W

    TH = _pick_row_tile(H, W, Cin, Cout)
    T = H // TH
    HWt = TH * W

    # lane-packing factor: smallest P with P*4*Cout % 128 == 0 (P == 1 for production
    # channel counts where 4*Cout is already a multiple of 128)
    P = 128 // math.gcd(4 * Cout, 128)
    if P > 1 and (HWt % P != 0 or HWt > 4096):
        P = 1   # fall back to direct (masked) stores for odd/huge tiles

    # --- input prep (wrapper): NCHW -> NHWC, bf16, pad 1 at ORIGINAL resolution, then
    #     halo'd row tiles so the kernel uses plain non-overlapping BlockSpecs. --------
    x_nhwc = jnp.transpose(x_nchw, (0, 2, 3, 1)).astype(jnp.bfloat16)
    x_pad = jnp.pad(x_nhwc, ((0, 0), (1, 1), (1, 1), (0, 0)))        # (N, H+2, W+2, Cin)
    x_tiles = jnp.stack([x_pad[:, t * TH:t * TH + TH + 2] for t in range(T)],
                        axis=1)                                      # (N, T, TH+2, W+2, Cin)

    # --- fold the nearest-2x upsample into the weights --------------------------------
    # A[phase, d, k]: original-row offset d (0,1,2 == -1,0,+1) that receives 3x3-kernel
    # row k, for output-row parity `phase`.
    A = jnp.array([[[1., 0., 0.],
                    [0., 1., 1.],
                    [0., 0., 0.]],
                   [[0., 0., 0.],
                    [1., 1., 0.],
                    [0., 0., 1.]]], dtype=jnp.float32)
    w_hwio = jnp.transpose(w_oihw, (2, 3, 1, 0)).astype(jnp.float32)   # (ky,kx,Cin,Cout)
    w_eff = jnp.einsum('pdk,qel,klio->pqdeio', A, A, w_hwio)           # (py,px,dy,dx,ci,co)
    # rows ordered (dy, dx, cin) / columns ordered (py, px, cout)
    w_all = jnp.transpose(w_eff, (2, 3, 4, 0, 1, 5)).reshape(9 * Cin, 4 * Cout)
    w_all = w_all.astype(jnp.bfloat16)

    cost = pl.CostEstimate(
        flops=2 * N * H * W * (9 * Cin) * (4 * Cout),
        transcendentals=0,
        bytes_accessed=(x_tiles.size * 2 + w_all.size * 2
                        + N * H * W * 4 * Cout * 2 + N * T * 2 * 4 * Cout * 4),
    )

    y, stats = pl.pallas_call(
        upconv_stats_kernel,
        out_shape=(
            jax.ShapeDtypeStruct((N, T, HWt // P, P * 4 * Cout), jnp.bfloat16),
            jax.ShapeDtypeStruct((N, T, 2, 4 * Cout), jnp.float32),
        ),
        grid=(N, T),
        in_specs=[
            pl.BlockSpec((1, 1, TH + 2, W + 2, Cin), lambda n, t: (n, t, 0, 0, 0)),
            pl.BlockSpec((9 * Cin, 4 * Cout), lambda n, t: (0, 0)),   # resident weights
        ],
        out_specs=(
            pl.BlockSpec((1, 1, HWt // P, P * 4 * Cout), lambda n, t: (n, t, 0, 0)),
            pl.BlockSpec((1, 1, 2, 4 * Cout), lambda n, t: (n, t, 0, 0)),
        ),
        compiler_params=pltpu.CompilerParams(
            dimension_semantics=("parallel", "parallel"),
            vmem_limit_bytes=64 * 1024 * 1024),
        cost_estimate=cost,
    )(x_tiles, w_all)

    # --- tiny per-channel BatchNorm math (training mode: biased batch variance) -------
    # The conv bias `b` cancels under train-mode BN:
    #   ((conv + b) - mean(conv + b)) == (conv - mean(conv)).
    count = float(N * OH * OW)
    st = stats.reshape(N, T, 2, 4, Cout).sum(axis=(0, 1, 3))           # (2, Cout)
    mean = st[0] / count
    var = jnp.maximum(st[1] / count - mean * mean, 0.0)
    scale = gamma.astype(jnp.float32) / jnp.sqrt(var + EPS)
    shift = beta.astype(jnp.float32) - mean * scale

    # --- epilogue: BN affine + ReLU + phase de-interleave + NCHW, one fused XLA pass.
    # TODO(synk): if the consumer accepted an NHWC / phase-packed layout, this relayout
    # of the largest tensor could be skipped or done by a dedicated lane-dense kernel.
    yb = y.reshape(N, H, W, 2, 2, Cout).astype(jnp.float32)            # (n, iy, ix, py, px, c)
    out = jnp.maximum(yb * scale + shift, 0.0)
    out = jnp.transpose(out, (0, 5, 1, 3, 2, 4))                       # (n, c, iy, py, ix, px)
    return out.reshape(N, Cout, OH, OW)


# ----------------------------------------------------------------------------
# Pure-JAX reference (mirrors the PyTorch forward in training mode, pure f32).
# ----------------------------------------------------------------------------
def reference_forward(x, w, b, gamma, beta):
    x_up = jnp.repeat(jnp.repeat(x, 2, axis=2), 2, axis=3)
    y = jax.lax.conv_general_dilated(
        x_up, w, window_strides=(1, 1), padding=((1, 1), (1, 1)),
        dimension_numbers=("NCHW", "OIHW", "NCHW"))
    y = y + b.reshape(1, -1, 1, 1)
    mean = y.mean(axis=(0, 2, 3), keepdims=True)
    var = y.var(axis=(0, 2, 3), keepdims=True)     # biased, like BN training mode
    yn = (y - mean) / jnp.sqrt(var + EPS)
    yn = yn * gamma.reshape(1, -1, 1, 1) + beta.reshape(1, -1, 1, 1)
    return jnp.maximum(yn, 0.0)


if __name__ == "__main__":
    key = jax.random.PRNGKey(0)
    kx, kw, kb, kg, kbe = jax.random.split(key, 5)

    N, Cin, Cout, H, W = 2, 4, 8, 16, 16                     # x: (2, 4, 16, 16)
    x = jax.random.normal(kx, (N, Cin, H, W), jnp.float32)

    fan_in = Cin * 3 * 3
    bound = 1.0 / jnp.sqrt(fan_in)
    w = jax.random.uniform(kw, (Cout, Cin, 3, 3), jnp.float32, -bound, bound)
    b = jax.random.uniform(kb, (Cout,), jnp.float32, -bound, bound)
    gamma = 1.0 + 0.1 * jax.random.normal(kg, (Cout,), jnp.float32)
    beta = 0.1 * jax.random.normal(kbe, (Cout,), jnp.float32)

    out = jax.block_until_ready(up_conv_forward(x, w, b, gamma, beta))
    ref = reference_forward(x, w, b, gamma, beta)

    assert out.shape == (N, Cout, 2 * H, 2 * W)
    # bf16 MXU operands + bf16 y writeback -> ~1e-2-level agreement with the pure-f32
    # reference; a layout / phase / packing bug would produce O(1) errors.
    err = float(jnp.max(jnp.abs(out - ref)))
    assert jnp.allclose(out, ref, rtol=4e-2, atol=4e-2), err

    print("KERNEL_OK")
</pallas_src>

<mosaic_0001>
module attributes {stable_mosaic.version = 11 : i64} {
  func.func @upconv_stats_kernel(%arg0: i32, %arg1: i32, %arg2: memref<1x1x10x18x4xbf16, #tpu.memory_space<vmem>>, %arg3: memref<36x32xbf16, #tpu.memory_space<vmem>>, %arg4: memref<1x1x32x128xbf16, #tpu.memory_space<vmem>>, %arg5: memref<1x1x2x32xf32, #tpu.memory_space<vmem>>) attributes {dimension_semantics = [#tpu.dimension_semantics<parallel>, #tpu.dimension_semantics<parallel>], iteration_bounds = array<i64: 2, 2>, scalar_prefetch = 0 : i64, scratch_operands = 0 : i64, tpu.core_type = #tpu.core_type<tc>, window_params = [{transform_indices = @transform_0, window_bounds = array<i64: 1, 1, 10, 18, 4>}, {pipeline_mode = #tpu.pipeline_mode<synchronous>, transform_indices = @transform_1, window_bounds = array<i64: 36, 32>}, {transform_indices = @transform_2, window_bounds = array<i64: 1, 1, 32, 128>}, {transform_indices = @transform_3, window_bounds = array<i64: 1, 1, 2, 32>}]} {
    %c0 = arith.constant 0 : index
    %c0_0 = arith.constant 0 : index
    %c0_1 = arith.constant 0 : index
    %c0_2 = arith.constant 0 : index
    %c0_3 = arith.constant 0 : index
    %0 = vector.load %arg2[%c0, %c0_0, %c0_1, %c0_2, %c0_3] : memref<1x1x10x18x4xbf16, #tpu.memory_space<vmem>>, vector<1x1x10x18x4xbf16>
    %1 = vector.shape_cast %0 : vector<1x1x10x18x4xbf16> to vector<10x18x4xbf16>
    %2 = vector.extract_strided_slice %1 {offsets = [0, 0, 0], sizes = [10, 16, 4], strides = [1, 1, 1]} : vector<10x18x4xbf16> to vector<10x16x4xbf16>
    %3 = vector.extract_strided_slice %1 {offsets = [0, 1, 0], sizes = [10, 16, 4], strides = [1, 1, 1]} : vector<10x18x4xbf16> to vector<10x16x4xbf16>
    %4 = vector.extract_strided_slice %1 {offsets = [0, 2, 0], sizes = [10, 16, 4], strides = [1, 1, 1]} : vector<10x18x4xbf16> to vector<10x16x4xbf16>
    %5 = tpu.concatenate %2, %3, %4 in 2 : vector<10x16x4xbf16>, vector<10x16x4xbf16>, vector<10x16x4xbf16> -> vector<10x16x12xbf16>
    %6 = vector.extract_strided_slice %5 {offsets = [0, 0, 0], sizes = [8, 16, 12], strides = [1, 1, 1]} : vector<10x16x12xbf16> to vector<8x16x12xbf16>
    %7 = vector.shape_cast %6 : vector<8x16x12xbf16> to vector<128x12xbf16>
    %8 = vector.extract_strided_slice %5 {offsets = [1, 0, 0], sizes = [8, 16, 12], strides = [1, 1, 1]} : vector<10x16x12xbf16> to vector<8x16x12xbf16>
    %9 = vector.shape_cast %8 : vector<8x16x12xbf16> to vector<128x12xbf16>
    %10 = vector.extract_strided_slice %5 {offsets = [2, 0, 0], sizes = [8, 16, 12], strides = [1, 1, 1]} : vector<10x16x12xbf16> to vector<8x16x12xbf16>
    %11 = vector.shape_cast %10 : vector<8x16x12xbf16> to vector<128x12xbf16>
    %12 = tpu.concatenate %7, %9, %11 in 1 : vector<128x12xbf16>, vector<128x12xbf16>, vector<128x12xbf16> -> vector<128x36xbf16>
    %c0_4 = arith.constant 0 : index
    %c0_5 = arith.constant 0 : index
    %13 = vector.load %arg3[%c0_4, %c0_5] : memref<36x32xbf16, #tpu.memory_space<vmem>>, vector<36x32xbf16>
    %cst = arith.constant dense<0.000000e+00> : vector<128x32xf32>
    %14 = tpu.matmul %12, %13, %cst {dimension_numbers = #tpu.dot_dimension_numbers<[1], [0], [0], [1], [0, 0, 1, 1], [], []>} : vector<128x36xbf16>, vector<36x32xbf16>, vector<128x32xf32> -> vector<128x32xf32>
    %cst_6 = arith.constant dense<0.000000e+00> : vector<32xf32>
    %15 = vector.multi_reduction <add>, %14, %cst_6 [0] : vector<128x32xf32> to vector<32xf32>
    %16 = vector.shape_cast %15 : vector<32xf32> to vector<1x32xf32>
    %17 = arith.mulf %14, %14 : vector<128x32xf32>
    %cst_7 = arith.constant dense<0.000000e+00> : vector<32xf32>
    %18 = vector.multi_reduction <add>, %17, %cst_7 [0] : vector<128x32xf32> to vector<32xf32>
    %19 = vector.shape_cast %18 : vector<32xf32> to vector<1x32xf32>
    %20 = tpu.concatenate %16, %19 in 0 : vector<1x32xf32>, vector<1x32xf32> -> vector<2x32xf32>
    %c0_8 = arith.constant 0 : index
    %c0_9 = arith.constant 0 : index
    %c0_10 = arith.constant 0 : index
    %c0_11 = arith.constant 0 : index
    %21 = vector.load %arg5[%c0_8, %c0_9, %c0_10, %c0_11] : memref<1x1x2x32xf32, #tpu.memory_space<vmem>>, vector<1x1x2x32xf32>
    %22 = vector.shape_cast %21 : vector<1x1x2x32xf32> to vector<2x32xf32>
    %23 = vector.shape_cast %20 : vector<2x32xf32> to vector<1x1x2x32xf32>
    tpu.vector_store %arg5[%c0_8, %c0_9, %c0_10, %c0_11], %23 {strides = array<i32>} : memref<1x1x2x32xf32, #tpu.memory_space<vmem>>, vector<1x1x2x32xf32>,
    %24 = arith.truncf %14 : vector<128x32xf32> to vector<128x32xbf16>
    %25 = tpu.iota {dimensions = array<i32: 0>} : vector<32x128xi32>
    %26 = tpu.iota {dimensions = array<i32: 1>} : vector<32x128xi32>
    %c4_i32 = arith.constant 4 : i32
    %27 = vector.broadcast %c4_i32 : i32 to vector<32x128xi32>
    %28 = arith.muli %27, %25 : vector<32x128xi32>
    %c0_i32 = arith.constant 0 : i32
    %29 = vector.broadcast %c0_i32 : i32 to vector<32x128xi32>
    %30 = arith.addi %28, %29 : vector<32x128xi32>
    %31 = arith.cmpi eq, %26, %30 : vector<32x128xi32>
    %cst_12 = arith.constant 1.000000e+00 : f32
    %cst_13 = arith.constant 0.000000e+00 : f32
    %32 = vector.broadcast %cst_12 : f32 to vector<32x128xf32>
    %33 = vector.broadcast %cst_13 : f32 to vector<32x128xf32>
    %34 = arith.select %31, %32, %33 : vector<32x128xi1>, vector<32x128xf32>
    %35 = arith.truncf %34 : vector<32x128xf32> to vector<32x128xbf16>
    %cst_14 = arith.constant dense<0.000000e+00> : vector<32x32xf32>
    %36 = tpu.matmul %35, %24, %cst_14 {dimension_numbers = #tpu.dot_dimension_numbers<[1], [0], [0], [1], [0, 0, 1, 1], [], []>} : vector<32x128xbf16>, vector<128x32xbf16>, vector<32x32xf32> -> vector<32x32xf32>
    %c4_i32_15 = arith.constant 4 : i32
    %37 = vector.broadcast %c4_i32_15 : i32 to vector<32x128xi32>
    %38 = arith.muli %37, %25 : vector<32x128xi32>
    %c1_i32 = arith.constant 1 : i32
    %39 = vector.broadcast %c1_i32 : i32 to vector<32x128xi32>
    %40 = arith.addi %38, %39 : vector<32x128xi32>
    %41 = arith.cmpi eq, %26, %40 : vector<32x128xi32>
    %cst_16 = arith.constant 1.000000e+00 : f32
    %cst_17 = arith.constant 0.000000e+00 : f32
    %42 = vector.broadcast %cst_16 : f32 to vector<32x128xf32>
    %43 = vector.broadcast %cst_17 : f32 to vector<32x128xf32>
    %44 = arith.select %41, %42, %43 : vector<32x128xi1>, vector<32x128xf32>
    %45 = arith.truncf %44 : vector<32x128xf32> to vector<32x128xbf16>
    %cst_18 = arith.constant dense<0.000000e+00> : vector<32x32xf32>
    %46 = tpu.matmul %45, %24, %cst_18 {dimension_numbers = #tpu.dot_dimension_numbers<[1], [0], [0], [1], [0, 0, 1, 1], [], []>} : vector<32x128xbf16>, vector<128x32xbf16>, vector<32x32xf32> -> vector<32x32xf32>
    %c4_i32_19 = arith.constant 4 : i32
    %47 = vector.broadcast %c4_i32_19 : i32 to vector<32x128xi32>
    %48 = arith.muli %47, %25 : vector<32x128xi32>
    %c2_i32 = arith.constant 2 : i32
    %49 = vector.broadcast %c2_i32 : i32 to vector<32x128xi32>
    %50 = arith.addi %48, %49 : vector<32x128xi32>
    %51 = arith.cmpi eq, %26, %50 : vector<32x128xi32>
    %cst_20 = arith.constant 1.000000e+00 : f32
    %cst_21 = arith.constant 0.000000e+00 : f32
    %52 = vector.broadcast %cst_20 : f32 to vector<32x128xf32>
    %53 = vector.broadcast %cst_21 : f32 to vector<32x128xf32>
    %54 = arith.select %51, %52, %53 : vector<32x128xi1>, vector<32x128xf32>
    %55 = arith.truncf %54 : vector<32x128xf32> to vector<32x128xbf16>
    %cst_22 = arith.constant dense<0.000000e+00> : vector<32x32xf32>
    %56 = tpu.matmul %55, %24, %cst_22 {dimension_numbers = #tpu.dot_dimension_numbers<[1], [0], [0], [1], [0, 0, 1, 1], [], []>} : vector<32x128xbf16>, vector<128x32xbf16>, vector<32x32xf32> -> vector<32x32xf32>
    %c4_i32_23 = arith.constant 4 : i32
    %57 = vector.broadcast %c4_i32_23 : i32 to vector<32x128xi32>
    %58 = arith.muli %57, %25 : vector<32x128xi32>
    %c3_i32 = arith.constant 3 : i32
    %59 = vector.broadcast %c3_i32 : i32 to vector<32x128xi32>
    %60 = arith.addi %58, %59 : vector<32x128xi32>
    %61 = arith.cmpi eq, %26, %60 : vector<32x128xi32>
    %cst_24 = arith.constant 1.000000e+00 : f32
    %cst_25 = arith.constant 0.000000e+00 : f32
    %62 = vector.broadcast %cst_24 : f32 to vector<32x128xf32>
    %63 = vector.broadcast %cst_25 : f32 to vector<32x128xf32>
    %64 = arith.select %61, %62, %63 : vector<32x128xi1>, vector<32x128xf32>
    %65 = arith.truncf %64 : vector<32x128xf32> to vector<32x128xbf16>
    %cst_26 = arith.constant dense<0.000000e+00> : vector<32x32xf32>
    %66 = tpu.matmul %65, %24, %cst_26 {dimension_numbers = #tpu.dot_dimension_numbers<[1], [0], [0], [1], [0, 0, 1, 1], [], []>} : vector<32x128xbf16>, vector<128x32xbf16>, vector<32x32xf32> -> vector<32x32xf32>
    %67 = tpu.concatenate %36, %46, %56, %66 in 1 : vector<32x32xf32>, vector<32x32xf32>, vector<32x32xf32>, vector<32x32xf32> -> vector<32x128xf32>
    %68 = arith.truncf %67 : vector<32x128xf32> to vector<32x128xbf16>
    %c0_27 = arith.constant 0 : index
    %c0_28 = arith.constant 0 : index
    %c0_29 = arith.constant 0 : index
    %c0_30 = arith.constant 0 : index
    %69 = vector.load %arg4[%c0_27, %c0_28, %c0_29, %c0_30] : memref<1x1x32x128xbf16, #tpu.memory_space<vmem>>, vector<1x1x32x128xbf16>
    %70 = vector.shape_cast %69 : vector<1x1x32x128xbf16> to vector<32x128xbf16>
    %71 = vector.shape_cast %68 : vector<32x128xbf16> to vector<1x1x32x128xbf16>
    tpu.vector_store %arg4[%c0_27, %c0_28, %c0_29, %c0_30], %71 {strides = array<i32>} : memref<1x1x32x128xbf16, #tpu.memory_space<vmem>>, vector<1x1x32x128xbf16>,
    return
  }
  func.func @transform_0(%arg0: i32, %arg1: i32) -> (i32, i32, i32, i32, i32) {
    %c0_i32 = arith.constant 0 : i32
    %c0_i32_0 = arith.constant 0 : i32
    %c0_i32_1 = arith.constant 0 : i32
    %c0_i32_2 = arith.constant 0 : i32
    return %arg0, %arg1, %c0_i32, %c0_i32_0, %c0_i32_1 : i32, i32, i32, i32, i32
  }
  func.func @transform_1(%arg0: i32, %arg1: i32) -> (i32, i32) {
    %c0_i32 = arith.constant 0 : i32
    %c0_i32_0 = arith.constant 0 : i32
    %c0_i32_1 = arith.constant 0 : i32
    return %c0_i32, %c0_i32_0 : i32, i32
  }
  func.func @transform_2(%arg0: i32, %arg1: i32) -> (i32, i32, i32, i32) {
    %c0_i32 = arith.constant 0 : i32
    %c0_i32_0 = arith.constant 0 : i32
    %c0_i32_1 = arith.constant 0 : i32
    return %arg0, %arg1, %c0_i32, %c0_i32_0 : i32, i32, i32, i32
  }
  func.func @transform_3(%arg0: i32, %arg1: i32) -> (i32, i32, i32, i32) {
    %c0_i32 = arith.constant 0 : i32
    %c0_i32_0 = arith.constant 0 : i32
    %c0_i32_1 = arith.constant 0 : i32
    return %arg0, %arg1, %c0_i32, %c0_i32_0 : i32, i32, i32, i32
  }
}

</mosaic_0001>

<bundles_post_ra>
// kernel: up_conv_forward.1
= control target key start
LH: loop header
LB: loop body
LE: loop exit
PB: predicated region body
PF: predicated region fallthrough
CT: control target
= control target key end

     0   :  { %s2684_s0 = inlined_call_operand.hbm [shape: bf16[2,2,10,18,4], index: 0, kind: input, shape index: {}]   ;;  %s2685_s1 = inlined_call_operand.hbm [shape: bf16[36,32], index: 1, kind: input, shape index: {}]   ;;  %s2686_s2 = inlined_call_operand.hbm [shape: bf16[2,2,32,128], index: 2, kind: output, shape index: {0}]   ;;  %s2687_s3 = inlined_call_operand.hbm [shape: f32[2,2,2,32], index: 3, kind: output, shape index: {1}]  }
   0x1   :  { %2697 = sst [smem:[#allocation17_spill]] %s2685_s1 }
   0x2   :  { %9 = vsyncpa [#allocation3], 0 }
   0x3   :  { %11 = vsyncpa [#allocation3 + $0x1], 0 }
   0x4   :  { %12 = vsyncpa [#allocation6], 0 }
   0x5   :  { %13 = vsyncpa [#allocation4], 0 }
   0x6   :  { %15 = vsyncpa [#allocation4 + $0x1], 0 }
   0x7   :  { %16 = vsyncpa [#allocation9], 0 }
   0x8   :  { %18 = vsyncpa [#allocation9 + $0x1], 0  ;;  %s2035_s12 = smov 0   ;;  %s2037_s13 = smov 0  }
   0x9   :  { %s2039_s14 = smov 0   ;;  %s2041_s15 = smov 0  }
   0xa   :  { %s2043_s16 = smov 0   ;;  %s2045_s17 = smov 0  }
   0xb   :  { %s2047_s18 = smov 0   ;;  %s2049_s19 = smov 0  }
   0xc LB: > { %2698 = sst [smem:[#allocation14_spill]] %s1991_s17  ;;  %s1407_s20 = sadd.s32 4294967295, %s1999_s19   ;;  %s1999_s19 = sphi %s2049_s19, %s24_s19   ;;  %s1995_s18 = sphi %s2047_s18, %s2736_s18   ;;  %s1991_s17 = sphi %s2045_s17, %s2730_s17   ;;  %s1987_s16 = sphi %s2043_s16, %s2735_s16   ;;  %s1983_s15 = sphi %s2041_s15, %s2729_s15   ;;  %s1979_s14 = sphi %s2039_s14, %s2734_s14   ;;  %s1975_s13 = sphi %s2037_s13, %s2733_s13   ;;  %s1971_s12 = sphi %s2035_s12, %s2732_s12  }
   0xd   : > { %s1408_s21 = sadd.s32 4294967294, %s1999_s19   ;;  %p58_p0 = scmp.ne.s32.totalorder %s1975_s13, %s1971_s12 }
   0xe   : > { %p2079_p1 = scmp.eq.s32.totalorder %s1407_s20, 0  ;;  %p2083_p2 = scmp.eq.s32.totalorder %s1407_s20, 3 }
   0xf   : > { %p111_p3 = scmp.eq.s32.totalorder %s1408_s21, 3  ;;  %p1409_p5 = scmp.ge.s32.totalorder %s1999_s19, 1 }
  0x10   : > { %s2699_s22 = scalar_select %p2079_p1, 1, 0 }
  0x11   : > { %s2700_s23 = scalar_select %p2083_p2, 1, 0 }
  0x12   : > { %p2089_p4 = por %p2079_p1, %p58_p0  ;;  %p2094_p6 = por %p111_p3, %p58_p0 }
  0x13   : > { %p146_p7 = scmp.lt.s32.totalorder %s1999_s19, 5  ;;  %s2001_s27 = smov [#allocation5]  }
  0x14   : > { %s2701_s24 = scalar_select %p2089_p4, 1, 0 }
  0x15   : > { %s2702_s25 = scalar_select %p2094_p6, 1, 0 }
  0x16   : > { %p2099_p8 = pnand %p1409_p5, %p146_p7  ;;  %s158_s28 = sshll.u32 %s2001_s27, 4  ;;  %s159_s28 = int_to_ptr.vmem [resolvable:$true] %s158_s28 }
  0x17   : > { %s2705_s1 = sld [smem:[#allocation17_spill]] }
  0x18   : > { %s2703_s26 = scalar_select %p2099_p8, 1, 0 }
  0x19   : > { %p1660_p9 = pneg %p2099_p8 }
  0x1b   : > { %p2107_p10 = pnand %p1660_p9, %p2079_p1 }
  0x1d   : > { %s1807_s5 = scalar_lea.hbm %s2705_s1, 320  ;;  %p1809_p12 = pneg %p2107_p10 }
  0x1e   : > { %p1808_p11 = scmp.ne.s32.totalorder %s2705_s1, %s1807_s5  ;;  %p1814_p3 = scmp.lt.u32.totalorder %s1807_s5, %s2705_s1 }
  0x20   : > { %p1810_p13 = pnand %p1809_p12, %p1808_p11 }
  0x22   : > { %p1811_p0 = pneg %p1810_p13 }
  0x24   : > { %p1816_p5 = pnand %p1814_p3, %p1811_p0 }
  0x26   : > { %1819 = shalt.err (!%p1816_p5)
}
  0x27   : > { %s1820_s10 = scalar_lea.vmem %s159_s28, 320  ;;  %p1828_p1 = scmp.lt.s32.totalorder %s159_s28, %s159_s28 }
  0x28   : > { %p1821_p7 = scmp.ne.s32.totalorder %s159_s28, %s1820_s10  ;;  %p1829_p4 = scmp.lt.s32.totalorder %s1820_s10, %s1820_s10 }
  0x2a   : > { %p1823_p9 = pnand %p1821_p7, %p1809_p12  ;;  %p1830_p8 = por %p1829_p4, %p1828_p1 }
  0x2c   : > { %p1824_p6 = pneg %p1823_p9 }
  0x2e   : > { %p1831_p2 = pnand %p1830_p8, %p1824_p6 }
  0x30   : > { %1834 = shalt.err (!%p1831_p2)
}
  0x31   : > { %s2692_s11 = smov 64   ;;  %s2693_s20 = smov 4  }
  0x32   : > { %1663 = dma.hbm_to_vmem [thread:$0]  (!%p2107_p10), %s2705_s1, 320, %s159_s28, [#allocation6], %s2692_s11, %s2692_s11, %s2693_s20  }
  0x33   : > { %s33_s30 = sadd.s32 1, %s1991_s17  ;;  %s36_s4 = sadd.s32 1, %s1995_s18 }
  0x34   : > { %p34_p1 = scmp.ge.s32.totalorder %s33_s30, 2  ;;  %s45_s5 = sadd.s32 1, %s1979_s14 }
  0x35   : > { %p52_p2 = scmp.ne.s32.totalorder %s1979_s14, %s1975_s13  ;;  %p53_p4 = scmp.eq.s32.totalorder %s1999_s19, 0 }
  0x36   : > { %s2738_s30 = smov (%p34_p1, %s33_s30), 0  ;;  %s2740_s4 = smov (!%p34_p1, %s36_s4), %s1995_s18 }
  0x37   : > { %2706 = sst [smem:[#allocation15_spill]] %s2738_s30  ;;  %s41_s29 = ssub.s32 %s1991_s17, %s2738_s30 }
  0x38   : > { %p38_p6 = scmp.ge.s32.totalorder %s2740_s4, 2  ;;  %p2707_p8 = scmp.ne.s32.totalorder %s2700_s23, 0 }
  0x39   : > { %p54_p10 = por %p53_p4, %p52_p2  ;;  %p1676_p12 = scmp.lt.s32.totalorder %s1999_s19, 4 }
  0x3a   : > { %p2143_p11 = por %p2707_p8, %p52_p2  ;;  %s2742_s4 = smov (%p38_p6, %s2740_s4), 0 }
  0x3b   : > { %2709 = sst [smem:[#allocation16_spill]] %s2742_s4  ;;  %s172_s28 = sand.u32 1, %s1979_s14  }
  0x3c   : > { %s1647_s7 = smul.u32 30, %s1991_s17  ;;  %s40_s8 = ssub.s32 %s1995_s18, %s2742_s4 }
  0x3d   : > { %s42_s9 = sor.u32 %s41_s29, %s40_s8  ;;  %s1646_s10 = smul.u32 120, %s172_s28 }
  0x3e   : > { %p43_p13 = scmp.eq.s32.totalorder %s42_s9, 0  ;;  %s1648_s21 = smul.u32 60, %s1995_s18 }
  0x3f   : > { %p2155_p0 = pnand %p1676_p12, %p54_p10  ;;  %s176_s20 = scalar_lea.vmem [#allocation2], %s1646_s10 }
  0x40   : > { %s2160_s23 = scalar_select %p43_p13, %s1979_s14, %s45_s5  }
  0x41   : > { %s182_s11 = sadd.s32 %s1648_s21, %s1647_s7  ;;  %s185_s1 = sshll.u32 %s176_s20, 4  ;;  %s2162_s1 = int_to_ptr.vmem [resolvable:$true] %s185_s1 }
  0x42   : > { %s1412_s30 = sshll.u32 %s182_s11, 6  ;;  %s2169_s8 = scalar_lea.sflag [#allocation3], %s172_s28 }
  0x43   : > { %s2167_s29 = scalar_lea.hbm %s2684_s0, %s1412_s30  ;;  %p1837_p5 = pneg %p2155_p0 }
  0x44   : > { %s1835_s9 = scalar_lea.hbm %s2167_s29, 1920  ;;  %s1840_s17 = scalar_lea.hbm %s2684_s0, 7680 }
  0x45   : > { %p1836_p3 = scmp.ne.s32.totalorder %s2167_s29, %s1835_s9  ;;  %p1841_p1 = scmp.lt.u32.totalorder %s2167_s29, %s2684_s0 }
  0x46   : > { %p1842_p2 = scmp.lt.u32.totalorder %s1840_s17, %s1835_s9  ;;  %p1844_p6 = scmp.lt.u32.totalorder %s1835_s9, %s2167_s29 }
  0x47   : > { %p1838_p7 = pnand %p1837_p5, %p1836_p3 }
  0x48   : > { %p1843_p4 = por %p1842_p2, %p1841_p1 }
  0x49   : > { %p1839_p9 = pneg %p1838_p7 }
  0x4a   : > { %p1845_p8 = por %p1844_p6, %p1843_p4 }
  0x4c   : > { %p1846_p10 = pnand %p1845_p8, %p1839_p9 }
  0x4e   : > { %1849 = shalt.err (!%p1846_p10)
}
  0x4f   : > { %s1850_s5 = scalar_lea.vmem %s2162_s1, 1920  ;;  %s2004_s28 = smov [#allocation2]  }
  0x50   : > { %p1851_p12 = scmp.ne.s32.totalorder %s2162_s1, %s1850_s5  ;;  %s1855_s7 = sshll.u32 %s2004_s28, 4  ;;  %s1856_s7 = int_to_ptr.vmem [resolvable:$false] %s1855_s7 }
  0x51   : > { %s1857_s10 = scalar_lea.vmem %s1856_s7, 3840  ;;  %p1858_p7 = scmp.lt.s32.totalorder %s2162_s1, %s1856_s7 }
  0x52   : > { %p1853_p13 = pnand %p1851_p12, %p1837_p5  ;;  %p1859_p1 = scmp.lt.s32.totalorder %s1857_s10, %s1850_s5 }
  0x54   : > { %p1854_p3 = pneg %p1853_p13  ;;  %p1860_p2 = por %p1859_p1, %p1858_p7 }
  0x56   : > { %p1861_p4 = pnand %p1860_p2, %p1854_p3 }
  0x58   : > { %1864 = shalt.err (!%p1861_p4)
}
  0x59   : > { %s2711_s21 = smov 4   ;;  %s2712_s9 = smov 64  }
  0x5a   : > { %1667 = dma.hbm_to_vmem [thread:$0]  (!%p2155_p0), %s2167_s29, 1920, %s2162_s1, %s2169_s8, %s2712_s9, %s2712_s9, %s2711_s21  }
  0x5b   : > { %p2713_p5 = scmp.ne.s32.totalorder %s2703_s26, 0 }
  0x5c   : > { %s2203_s11 = sand.u32 (!%p2713_p5), 1, %s1975_s13   ;;  %p2714_p9 = scmp.ne.s32.totalorder (!%p2713_p5), %s2701_s24, 0 }
  0x5d   : > { %197 = sbr.rel (%p2713_p5) target bundleno = 1003 (0x3eb), region = 28  ;;  %s200_s17 = scalar_lea.sflag (!%p2713_p5), [#allocation3], %s2203_s11 }
  0x5e   : > { %s1649_s20 = smul.u32 (!%p2713_p5), 120, %s2203_s11 }
  0x60   : > { %s2207_s30 = scalar_lea.vmem (!%p2713_p5), [#allocation2], %s1649_s20 }
  0x64   : > { %1954 = dma.done.wait (%p2714_p9), %s200_s17, 1920  }
  0x65   : > { %1956 = vsyncadd (%p2714_p9), %s200_s17, 4294965376  ;;  %p2715_p0 = scmp.ne.s32.totalorder %s2699_s22, 0 }
  0x67   : > { %1958 = dma.done.wait (%p2715_p0), [#allocation6], 320  }
  0x68   : > { %1960 = vsyncadd (%p2715_p0), [#allocation6], 4294966976  ;;  %vm346_vm0 = vsmask.f32 7424  ;;  %vm487_vm1 = vcmask 1046528   ;;  %v2218_v0 = vld [vmem:[%s2207_s30 + $0xc] sm:$0xff]  }
  0x69   : > { %v1785_v1 = vld [vmem:[%s2207_s30 + $0x14] ss:$0 sps:$4 sm:$0x11]   ;;  %v2222_v2 = vld [vmem:[%s2207_s30 + $0x18] sm:$0xff]   ;;  %v360_v3 = vshrl.u32 %v2218_v0, 16  ;;  %v362_v4 = vshll.u32 %v2218_v0, 16 }
  0x6a   : > { %v367_v5 = vshll.u32 %v1785_v1, 16  ;;  %v491_v6 = vrot.slane %v2218_v0, 1  ;;  %v492_v7 = vrot.slane %v1785_v1, 1  ;;  %v1787_v8 = vld [vmem:[%s2207_s30 + $0x20] ss:$0 sps:$4 sm:$0x11]  }
  0x6b   : > { %v372_v9 = vshrl.u32 %v2222_v2, 16  ;;  %v374_v10 = vshll.u32 %v2222_v2, 16  ;;  %v364_v11 = vrot.slane %v362_v4, 1  ;;  %v379_v15 = vshll.u32 %v1787_v8, 16  ;;  %v2232_v16 = vld [vmem:[%s2207_s30 + $0x24] sm:$0xff]   ;;  %s2005_s1 = smov 8  }
  0x6c   : > { %v369_v12 = vrot.slane %v367_v5, 1  ;;  %v493_v13 = vsel %vm487_vm1, %v491_v6, %v492_v7  ;;  %v1789_v17 = vld [vmem:[%s2207_s30 + $0x2c] ss:$0 sps:$4 sm:$0x11]   ;;  %v494_v19 = vrot.slane %v2222_v2, 1  ;;  %v495_v20 = vrot.slane %v1787_v8, 1 }
  0x6d   : > { %v376_v14 = vrot.slane %v374_v10, 1  ;;  %v365_v18 = vor.u32 %v364_v11, %v360_v3  ;;  %520 = vrot.lane.b32.xlu1 %v493_v13, %s2005_s1  ;;  %v381_v22 = vrot.slane %v379_v15, 1  ;;  %v384_v23 = vshrl.u32 %v2232_v16, 16  ;;  %v2240_v25 = vld [vmem:[%s2207_s30 + $0x30] sm:$0xff]   ;;  %v2246_v30 = vld [vmem:[%s2207_s30 + $0x3c] sm:$0xff]   ;;  %s2006_s22 = smov 4  }
  0x6e   : > { %v386_v24 = vshll.u32 %v2232_v16, 16  ;;  %v391_v27 = vshll.u32 %v1789_v17, 16  ;;  %v497_v28 = vrot.slane %v2232_v16, 1  ;;  %v1791_v29 = vld [vmem:[%s2207_s30 + $0x38] ss:$0 sps:$4 sm:$0x11]   ;;  %v496_v48 = vsel %vm487_vm1, %v494_v19, %v495_v20 }
  0x6f   : > { %v377_v21 = vor.u32 %v376_v14, %v372_v9  ;;  %v370_v26 = vsel %vm346_vm0, %v365_v18, %v369_v12  ;;  %v498_v33 = vrot.slane %v1789_v17, 1  ;;  %v396_v34 = vshrl.u32 %v2240_v25, 16  ;;  %v2252_v35 = vld [vmem:[%s2207_s30 + $0x48] sm:$0xff]   ;;  %v1793_v41 = vld [vmem:[%s2207_s30 + $0x44] ss:$0 sps:$4 sm:$0x11]  }
  0x70   : > { %469 = vrot.lane.b32.xlu0 %v370_v26, %s2006_s22  ;;  %v388_v32 = vrot.slane %v386_v24, 1  ;;  %v393_v36 = vrot.slane %v391_v27, 1  ;;  %v398_v37 = vshll.u32 %v2240_v25, 16  ;;  %v403_v38 = vshll.u32 %v1791_v29, 16  ;;  %v2261_v47 = vld [vmem:[%s2207_s30 + $0x54] sm:$0xff]   ;;  %v2277_v4 = vld [vmem:[%s2207_s30 + $0x60] sm:$0xff]  }
  0x71   : > { %v382_v31 = vsel %vm346_vm0, %v377_v21, %v381_v22  ;;  %v408_v39 = vshrl.u32 %v2246_v30, 16  ;;  %v410_v42 = vshll.u32 %v2246_v30, 16  ;;  %v415_v46 = vshll.u32 %v1793_v41, 16  ;;  %v1795_v51 = vld [vmem:[%s2207_s30 + $0x50] ss:$0 sps:$4 sm:$0x11]  }
  0x72   : > { %v389_v40 = vor.u32 %v388_v32, %v384_v23  ;;  %v400_v43 = vrot.slane %v398_v37, 1  ;;  %v405_v50 = vrot.slane %v403_v38, 1  ;;  %v499_v52 = vsel %vm487_vm1, %v497_v28, %v498_v33  ;;  %v1797_v60 = vld [vmem:[%s2207_s30 + $0x5c] ss:$0 sps:$4 sm:$0x11]   ;;  %v2282_v9 = vld [vmem:[%s2207_s30 + $0x6c] sm:$0xff]  }
  0x73   : > { %v412_v45 = vrot.slane %v410_v42, 1  ;;  %v417_v54 = vrot.slane %v415_v46, 1  ;;  %v422_v55 = vshll.u32 %v2252_v35, 16  ;;  %v500_v56 = vrot.slane %v2240_v25, 1  ;;  %v2300_v32 = vld [vmem:[%s2207_s30] sm:$0xff]   ;;  %s2007_s24 = smov 12  }
  0x74   : > { %471 = vrot.lane.b32.xlu0 %v382_v31, %s2006_s22  ;;  %v394_v44 = vsel %vm346_vm0, %v389_v40, %v393_v36  ;;  %v401_v49 = vor.u32 %v400_v43, %v396_v34  ;;  %v501_v57 = vrot.slane %v1791_v29, 1  ;;  %v503_v58 = vrot.slane %v2246_v30, 1  ;;  %v1799_v13 = vld [vmem:[%s2207_s30 + $0x68] ss:$0 sps:$4 sm:$0x11]   ;;  %s2008_s26 = smov 24  }
  0x75   : > { %473 = vrot.lane.b32.xlu1 %v394_v44, %s2006_s22  ;;  %v413_v53 = vor.u32 %v412_v45, %v408_v39  ;;  %v427_v59 = vshll.u32 %v1795_v51, 16  ;;  %v434_v61 = vshll.u32 %v2261_v47, 16  ;;  %v504_v63 = vrot.slane %v1793_v41, 1  ;;  %v1801_v19 = vld [vmem:[%s2207_s30 + $0x74] ss:$0 sps:$4 sm:$0x11]  }
  0x76   : > { %v406_v62 = vsel %vm346_vm0, %v401_v49, %v405_v50  ;;  %v420_v1 = vshrl.u32 %v2252_v35, 16  ;;  %v424_v3 = vrot.slane %v422_v55, 1  ;;  %v432_v6 = vshrl.u32 %v2261_v47, 16  ;;  %v1803_v40 = vld [vmem:[%s2207_s30 + $0x8] ss:$0 sps:$4 sm:$0x11]  }
  0x77   : > { %v418_v5 = vsel %vm346_vm0, %v413_v53, %v417_v54  ;;  %v436_v7 = vrot.slane %v434_v61, 1  ;;  %v439_v8 = vshll.u32 %v1797_v60, 16  ;;  %v429_v10 = vrot.slane %v427_v59, 1  ;;  %s1416_s27 = sshll.u32 %s2203_s11, 1  ;;  %s2010_s8 = smov 32  }
  0x78   : > { %522 = vrot.lane.b32.xlu0 %v496_v48, %s2005_s1  ;;  %v502_v11 = vsel %vm487_vm1, %v500_v56, %v501_v57  ;;  %v425_v12 = vor.u32 %v424_v3, %v420_v1  ;;  %v446_v14 = vshll.u32 %v2277_v4, 16  ;;  %v505_v15 = vsel %vm487_vm1, %v503_v58, %v504_v63  ;;  %v1804_v63 = vld [vmem:[#allocation5] sm:$0xff]   ;;  %v1805_v1 = vld [vmem:[#allocation5 + $0x8] sm:$0xff]   ;;  %v1806_v3 = vld [vmem:[#allocation5 + $0x10] ss:$0 sps:$4 sm:$0x33]  }
  0x79   : > { %524 = vrot.lane.b32.xlu1 %v499_v52, %s2005_s1  ;;  %v437_v17 = vor.u32 %v436_v7, %v432_v6  ;;  %v441_v18 = vrot.slane %v439_v8, 1  ;;  %v458_v20 = vshll.u32 %v2282_v9, 16  ;;  %v506_v21 = vrot.slane %v2252_v35, 1  ;;  %1543 = vmatprep.subr.bf16.mxu0 %v1804_v63  ;;  %s2534_s29 = scalar_lea.vmem [#allocation8], %s1416_s27  ;;  %s1473_s4 = sshll.u32 %s1987_s16, 1 }
  0x7a   : > { %v507_v22 = vrot.slane %v1795_v51, 1  ;;  %v509_v23 = vrot.slane %v2261_v47, 1  ;;  %v510_v24 = vrot.slane %v1797_v60, 1  ;;  %v444_v26 = vshrl.u32 %v2277_v4, 16  ;;  %1544 = vmatpush3.bf16.msra.mxu0 %v1804_v63  ;;  %s1272_s5 = sadd.s32 %s1983_s15, %s1473_s4  ;;  %s1276_s9 = sshll.u32 %s2534_s29, 4  ;;  %s2578_s9 = int_to_ptr.vmem [resolvable:$true] %s1276_s9 }
  0x7b   : > { %v430_v27 = vsel %vm346_vm0, %v425_v12, %v429_v10  ;;  %v448_v28 = vrot.slane %v446_v14, 1  ;;  %v451_v29 = vshll.u32 %v1799_v13, 16  ;;  %v456_v31 = vshrl.u32 %v2282_v9, 16  ;;  %1545 = vmatprep.subr.bf16.mxu0 %v1805_v1  ;;  %s1474_s28 = sshll.u32 %s1272_s5, 5  ;;  %s2011_s20 = smov 64  }
  0x7c   : > { %475 = vrot.lane.b32.xlu0 %v406_v62, %s2006_s22  ;;  %v442_v33 = vsel %vm346_vm0, %v437_v17, %v441_v18  ;;  %v460_v34 = vrot.slane %v458_v20, 1  ;;  %v463_v36 = vshll.u32 %v1801_v19, 16  ;;  %v508_v37 = vsel %vm487_vm1, %v506_v21, %v507_v22  ;;  %s2574_s21 = scalar_lea.hbm %s2687_s3, %s1474_s28  ;;  %s1243_s17 = scalar_lea.sflag [#allocation9], %s2203_s11 }
  0x7d   : > { %477 = vrot.lane.b32.xlu1 %v418_v5, %s2006_s22  ;;  %v449_v38 = vor.u32 %v448_v28, %v444_v26  ;;  %v453_v39 = vrot.slane %v451_v29, 1  ;;  %v350_v41 = vshll.u32 %v2300_v32, 16  ;;  %v511_v42 = vsel %vm487_vm1, %v509_v23, %v510_v24  ;;  %s1865_s30 = scalar_lea.vmem %s2578_s9, 32 }
  0x7e   : > { %v461_v43 = vor.u32 %v460_v34, %v456_v31  ;;  %v465_v44 = vrot.slane %v463_v36, 1  ;;  %v512_v45 = vrot.slane %v2277_v4, 1  ;;  %v513_v46 = vrot.slane %v1799_v13, 1  ;;  %1546 = vmatpush3.bf16.msra.mxu0 %v1805_v1  ;;  %p1866_p6 = scmp.ne.s32.totalorder %s2578_s9, %s1865_s30 }
  0x7f   : > { %v454_v48 = vsel %vm346_vm0, %v449_v38, %v453_v39  ;;  %v348_v49 = vshrl.u32 %v2300_v32, 16  ;;  %v352_v50 = vrot.slane %v350_v41, 1  ;;  %v355_v51 = vshll.u32 %v1803_v40, 16 }
  0x80   : > { %526 = vrot.lane.b32.xlu0 %v502_v11, %s2005_s1  ;;  %v466_v52 = vsel %vm346_vm0, %v461_v43, %v465_v44  ;;  %v515_v53 = vrot.slane %v2282_v9, 1  ;;  %v516_v54 = vrot.slane %v1801_v19, 1  ;;  %v514_v55 = vsel %vm487_vm1, %v512_v45, %v513_v46  ;;  %p1867_p8 = pnand %p1866_p6, %p2143_p11 }
  0x81   : > { %528 = vrot.lane.b32.xlu1 %v505_v15, %s2005_s1  ;;  %v353_v56 = vor.u32 %v352_v50, %v348_v49  ;;  %v357_v57 = vrot.slane %v355_v51, 1  ;;  %v488_v59 = vrot.slane %v2300_v32, 1  ;;  %v489_v60 = vrot.slane %v1803_v40, 1 }
  0x82   : > { %v517_v58 = vsel %vm487_vm1, %v515_v53, %v516_v54  ;;  %vm692_vm2 = vcmask 1041408   ;;  %vm538_vm3 = vcmask 31744   ;;  %vm559_vm4 = vcmask 64512   ;;  %p1868_p10 = pneg %p1867_p8 }
  0x83   : > { %v358_v61 = vsel %vm346_vm0, %v353_v56, %v357_v57  ;;  %v490_v62 = vsel %vm487_vm1, %v488_v59, %v489_v60  ;;  %1645 = vmatprep.subr.msk.bf16.mxu0 %vm692_vm2, %v1806_v3  ;;  %v694_v5 = vsel %vm692_vm2, %v1806_v3, 0  ;;  %vm621_vm5 = vcmask 97280  }
  0x84   : > { %479 = vrot.lane.b32.xlu0 %v430_v27, %s2006_s22  ;;  %1548 = vmatpush3.bf16.msra.mxu0 %v694_v5  ;;  %vm638_vm6 = vcmask 195584   ;;  %vm675_vm7 = vcmask 293888  }
  0x85   : > { %481 = vrot.lane.b32.xlu1 %v442_v33, %s2006_s22 }
  0x88   : > { %530 = vrot.lane.b32.xlu0 %v508_v37, %s2005_s1 }
  0x89   : > { %532 = vrot.lane.b32.xlu1 %v511_v42, %s2005_s1 }
  0x8c   : > { %483 = vrot.lane.b32.xlu0 %v454_v48, %s2006_s22 }
  0x8d   : > { %485 = vrot.lane.b32.xlu1 %v466_v52, %s2006_s22 }
  0x90   : > { %534 = vrot.lane.b32.xlu0 %v514_v55, %s2005_s1 }
  0x91   : > { %536 = vrot.lane.b32.xlu1 %v517_v58, %s2005_s1 }
  0x94   : > { %467 = vrot.lane.b32.xlu0 %v358_v61, %s2006_s22 }
  0x95   : > { %518 = vrot.lane.b32.xlu1 %v490_v62, %s2005_s1  ;;  %s2012_s1 = smov [#allocation8]  }
  0xdf   : > { %v521_v6 = vpop.permute.xlu1 %520 }
  0xe2   : > { %v470_v7 = vpop.permute.xlu0 %469 }
  0xe3   : > { %v542_v8 = vsel %vm538_vm3, %v2218_v0, %v470_v7 }
  0xe4   : > { %v2330_v10 = vsel %vm559_vm4, %v542_v8, %v521_v6 }
  0xe5   : > { %588 = vrot.lane.b32.xlu0 %v2330_v10, %s2007_s24 }
  0xe6   : > { %v472_v11 = vpop.permute.xlu0 %471 }
  0xe7   : > { %v474_v12 = vpop.permute.xlu1 %473  ;;  %v544_v13 = vsel %vm538_vm3, %v2222_v2, %v472_v11 }
  0xe8   : > { %v546_v18 = vsel %vm538_vm3, %v2232_v16, %v474_v12 }
  0xea   : > { %v523_v14 = vpop.permute.xlu0 %522 }
  0xeb   : > { %v525_v15 = vpop.permute.xlu1 %524  ;;  %v565_v17 = vsel %vm559_vm4, %v544_v13, %v523_v14 }
  0xec   : > { %590 = vrot.lane.b32.xlu1 %v565_v17, %s2007_s24  ;;  %605 = vrot.lane.b32.xlu0 %v565_v17, %s2008_s26  ;;  %v567_v20 = vsel %vm559_vm4, %v546_v18, %v525_v15  ;;  %v896_v15 = vlaneseq }
  0xee   : > { %v476_v0 = vpop.permute.xlu0 %475 }
  0xef   : > { %v478_v19 = vpop.permute.xlu1 %477  ;;  %v548_v2 = vsel %vm538_vm3, %v2240_v25, %v476_v0 }
  0xf0   : > { %607 = vrot.lane.b32.xlu1 %v567_v20, %s2008_s26  ;;  %592 = vrot.lane.b32.xlu0 %v567_v20, %s2007_s24  ;;  %v550_v23 = vsel %vm538_vm3, %v2246_v30, %v478_v19 }
  0xf2   : > { %v527_v21 = vpop.permute.xlu0 %526 }
  0xf3   : > { %v529_v22 = vpop.permute.xlu1 %528  ;;  %v569_v16 = vsel %vm559_vm4, %v548_v2, %v527_v21 }
  0xf4   : > { %594 = vrot.lane.b32.xlu1 %v569_v16, %s2007_s24  ;;  %609 = vrot.lane.b32.xlu0 %v569_v16, %s2008_s26  ;;  %v571_v27 = vsel %vm559_vm4, %v550_v23, %v529_v22 }
  0xf6   : > { %v480_v24 = vpop.permute.xlu0 %479 }
  0xf7   : > { %v482_v26 = vpop.permute.xlu1 %481  ;;  %v552_v25 = vsel %vm538_vm3, %v2252_v35, %v480_v24 }
  0xf8   : > { %611 = vrot.lane.b32.xlu1 %v571_v27, %s2008_s26  ;;  %596 = vrot.lane.b32.xlu0 %v571_v27, %s2007_s24  ;;  %v554_v30 = vsel %vm538_vm3, %v2261_v47, %v482_v26 }
  0xfa   : > { %v531_v28 = vpop.permute.xlu0 %530 }
  0xfb   : > { %v533_v29 = vpop.permute.xlu1 %532  ;;  %v573_v31 = vsel %vm559_vm4, %v552_v25, %v531_v28  ;;  %v2009_v25 = vmov 1.0|1.0  }
  0xfc   : > { %598 = vrot.lane.b32.xlu1 %v573_v31, %s2007_s24  ;;  %613 = vrot.lane.b32.xlu0 %v573_v31, %s2008_s26  ;;  %v575_v36 = vsel %vm559_vm4, %v554_v30, %v533_v29 }
  0xfe   : > { %v484_v33 = vpop.permute.xlu0 %483 }
  0xff   : > { %v486_v34 = vpop.permute.xlu1 %485  ;;  %v556_v35 = vsel %vm538_vm3, %v2277_v4, %v484_v33 }
 0x100   : > { %615 = vrot.lane.b32.xlu1 %v575_v36, %s2008_s26  ;;  %600 = vrot.lane.b32.xlu0 %v575_v36, %s2007_s24  ;;  %v558_v47 = vsel %vm538_vm3, %v2282_v9, %v486_v34 }
 0x102   : > { %v535_v37 = vpop.permute.xlu0 %534 }
 0x103   : > { %v537_v38 = vpop.permute.xlu1 %536  ;;  %v577_v39 = vsel %vm559_vm4, %v556_v35, %v535_v37 }
 0x104   : > { %602 = vrot.lane.b32.xlu1 %v577_v39, %s2007_s24  ;;  %617 = vrot.lane.b32.xlu0 %v577_v39, %s2008_s26  ;;  %v579_v41 = vsel %vm559_vm4, %v558_v47, %v537_v38  ;;  %s1869_s24 = sshll.u32 %s2012_s1, 4  ;;  %s1870_s24 = int_to_ptr.vmem [resolvable:$false] %s1869_s24 }
 0x105   : > { %p1872_p12 = scmp.lt.s32.totalorder %s2578_s9, %s1870_s24 }
 0x106   : > { %v468_v40 = vpop.permute.xlu0 %467 }
 0x107   : > { %v540_v42 = vsel %vm538_vm3, %v2300_v32, %v468_v40  ;;  %v519_v43 = vpop.permute.xlu1 %518 }
 0x108   : > { %619 = vrot.lane.b32.xlu1 %v579_v41, %s2008_s26  ;;  %v561_v4 = vsel %vm559_vm4, %v540_v42, %v519_v43  ;;  %s1871_s26 = scalar_lea.vmem %s1870_s24, 64 }
 0x109   : > { %p1873_p13 = scmp.lt.s32.totalorder %s1871_s26, %s1865_s30 }
 0x10b   : > { %p1874_p3 = por %p1873_p13, %p1872_p12 }
 0x10d   : > { %p1875_p7 = pnand %p1874_p3, %p1868_p10 }
 0x157   : > { %v589_v44 = vpop.permute.xlu0 %588 }
 0x158   : > { %v623_v9 = vsel %vm621_vm5, %v561_v4, %v589_v44 }
 0x15e   : > { %v591_v45 = vpop.permute.xlu1 %590  ;;  %v606_v46 = vpop.permute.xlu0 %605 }
 0x15f   : > { %v640_v48 = vsel %vm638_vm6, %v623_v9, %v606_v46  ;;  %v625_v32 = vsel %vm621_vm5, %v2330_v10, %v591_v45 }
 0x160   : > { %1549 = vmatprep.mubr.msk.bf16.mxu0 %vm675_vm7, %v640_v48 }
 0x162   : > { %v608_v49 = vpop.permute.xlu1 %607  ;;  %v593_v50 = vpop.permute.xlu0 %592 }
 0x163   : > { %v642_v51 = vsel %vm638_vm6, %v625_v32, %v608_v49  ;;  %v627_v52 = vsel %vm621_vm5, %v565_v17, %v593_v50  ;;  %v897_v17 = vshrl.u32 %v896_v15, 7 }
 0x164   : > { %1550 = vmatmul.mubr.msk.bf16.vlgmr.msra.gmra.mrb[0].mxu0 %vm675_vm7, %v642_v51 }
 0x165   : > { %v898_v18 = vadd.s32 8, %v897_v17  ;;  %v899_v0 = vadd.s32 16, %v897_v17  ;;  %v900_v19 = vadd.s32 24, %v897_v17 }
 0x166   : > { %v595_v53 = vpop.permute.xlu1 %594  ;;  %v610_v54 = vpop.permute.xlu0 %609 }
 0x167   : > { %v644_v55 = vsel %vm638_vm6, %v627_v52, %v610_v54  ;;  %v629_v56 = vsel %vm621_vm5, %v567_v20, %v595_v53  ;;  %v903_v20 = vmul.u32 4, %v897_v17  ;;  %v904_v2 = vmul.u32 4, %v898_v18 }
 0x168   : > { %1553 = vmatprep.mubr.msk.bf16.mxu0 %vm675_vm7, %v644_v55  ;;  %v905_v21 = vmul.u32 4, %v899_v0  ;;  %v906_v22 = vmul.u32 4, %v900_v19 }
 0x169   : > { %v966_v23 = vadd.s32 1, %v903_v20  ;;  %v967_v24 = vadd.s32 1, %v904_v2  ;;  %v1030_v30 = vadd.s32 2, %v904_v2  ;;  %v1093_v35 = vadd.s32 3, %v904_v2 }
 0x16a   : > { %v612_v57 = vpop.permute.xlu1 %611  ;;  %v597_v58 = vpop.permute.xlu0 %596  ;;  %v968_v26 = vadd.s32 1, %v905_v21  ;;  %v1031_v33 = vadd.s32 2, %v905_v21  ;;  %v1032_v34 = vadd.s32 2, %v906_v22  ;;  %v1094_v37 = vadd.s32 3, %v905_v21 }
 0x16b   : > { %v646_v59 = vsel %vm638_vm6, %v629_v56, %v612_v57  ;;  %v631_v60 = vsel %vm621_vm5, %v569_v16, %v597_v58  ;;  %v902_v16 = vand.u32 127, %v896_v15  ;;  %v1095_v38 = vadd.s32 3, %v906_v22 }
 0x16c   : > { %1554 = vmatmul.mubr.msk.bf16.gmra.mrb[4].mxu0 %vm675_vm7, %v646_v59 }
 0x16d   : > { %vm907_vm8 = vcmp.eq.s32.totalorder %v902_v16, %v903_v20  ;;  %vm908_vm9 = vcmp.eq.s32.totalorder %v902_v16, %v904_v2  ;;  %vm970_vm10 = vcmp.eq.s32.totalorder %v902_v16, %v966_v23  ;;  %vm971_vm11 = vcmp.eq.s32.totalorder %v902_v16, %v967_v24 }
 0x16e   : > { %v599_v61 = vpop.permute.xlu1 %598  ;;  %v614_v62 = vpop.permute.xlu0 %613  ;;  %vm1448_vm12 = vmpackc.low %vm908_vm9, %vm907_vm8  ;;  %vm909_vm13 = vcmp.eq.s32.totalorder %v902_v16, %v905_v21  ;;  %vm910_vm14 = vcmp.eq.s32.totalorder %v902_v16, %v906_v22  ;;  %vm972_vm15 = vcmp.eq.s32.totalorder %v902_v16, %v968_v26  ;;  %vm1036_vm8 = vcmp.eq.s32.totalorder %v902_v16, %v1032_v34 }
 0x16f   : > { %v648_v63 = vsel %vm638_vm6, %v631_v60, %v614_v62  ;;  %v633_v1 = vsel %vm621_vm5, %v571_v27, %v599_v61  ;;  %v969_v27 = vadd.s32 1, %v906_v22  ;;  %1581 = vmatprep.mubr.msk.bf16.mxu1 %vm1448_vm12, %v2009_v25  ;;  %vm1452_vm0 = vmpackc.low %vm971_vm11, %vm970_vm10  ;;  %vm1097_vm10 = vcmp.eq.s32.totalorder %v902_v16, %v1093_v35 }
 0x170   : > { %1557 = vmatprep.mubr.msk.bf16.mxu0 %vm675_vm7, %v648_v63  ;;  %vm2403_vm2 = vmpackc.low %vm910_vm14, %vm909_vm13  ;;  %vm1098_vm12 = vcmp.eq.s32.totalorder %v902_v16, %v1094_v37  ;;  %vm1099_vm13 = vcmp.eq.s32.totalorder %v902_v16, %v1095_v38 }
 0x171   : > { %vm973_vm1 = vcmp.eq.s32.totalorder %v902_v16, %v969_v27 }
 0x172   : > { %v616_v3 = vpop.permute.xlu1 %615  ;;  %v601_v5 = vpop.permute.xlu0 %600  ;;  %vm2407_vm3 = vmpackc.low %vm973_vm1, %vm972_vm15  ;;  %vm884_vm1 = vcmask 1040384  }
 0x173   : > { %v650_v6 = vsel %vm638_vm6, %v633_v1, %v616_v3  ;;  %v635_v7 = vsel %vm621_vm5, %v573_v31, %v601_v5  ;;  %v1029_v31 = vadd.s32 2, %v903_v20  ;;  %vm2423_vm15 = vmpackc.low %vm1099_vm13, %vm1098_vm12 }
 0x174   : > { %1558 = vmatmul.mubr.msk.bf16.gmra.mrb[8].mxu0 %vm675_vm7, %v650_v6 }
 0x175   : > { %vm1033_vm4 = vcmp.eq.s32.totalorder %v902_v16, %v1029_v31 }
 0x176   : > { %v603_v8 = vpop.permute.xlu1 %602  ;;  %v618_v10 = vpop.permute.xlu0 %617 }
 0x177   : > { %v652_v11 = vsel %vm638_vm6, %v635_v7, %v618_v10  ;;  %v637_v12 = vsel %vm621_vm5, %v575_v36, %v603_v8  ;;  %v1092_v36 = vadd.s32 3, %v903_v20  ;;  %vm1034_vm5 = vcmp.eq.s32.totalorder %v902_v16, %v1030_v30 }
 0x178   : > { %1561 = vmatprep.mubr.msk.bf16.mxu0 %vm675_vm7, %v652_v11 }
 0x179   : > { %vm1096_vm9 = vcmp.eq.s32.totalorder %v902_v16, %v1092_v36 }
 0x17a   : > { %v620_v13 = vpop.permute.xlu1 %619  ;;  %vm2419_vm14 = vmpackc.low %vm1097_vm10, %vm1096_vm9 }
 0x17b   : > { %v654_v14 = vsel %vm638_vm6, %v637_v12, %v620_v13  ;;  %vm2411_vm6 = vmpackc.low %vm1034_vm5, %vm1033_vm4 }
 0x17c   : > { %1562 = vmatmul.mubr.msk.bf16.gmra.mrb[12].mxu0 %vm675_vm7, %v654_v14  ;;  %vm1035_vm7 = vcmp.eq.s32.totalorder %v902_v16, %v1031_v33 }
 0x17d   : > { %1601 = vmatprep.mubr.msk.bf16.mxu0 %vm1452_vm0, %v2009_v25  ;;  %vm2415_vm11 = vmpackc.low %vm1036_vm8, %vm1035_vm7  ;;  %vm793_vm0 = vcmask 261120  }
 0x237   : > { %v1551_v42 = vpop.f32.mrb[0].mxu0 }
 0x238   : > { %v730_v43 = vpop.f32.mrb[1].mxu0  ;;  %v833_v9 = vmul.f32 %v1551_v42, %v1551_v42  ;;  %v797_v52 = vsel %vm793_vm0, %v1551_v42, 0.0 }
 0x239   : > { %v831_v4 = vmul.f32 %v730_v43, %v730_v43  ;;  %v1552_v44 = vpop.f32.mrb[2].mxu0  ;;  %v794_v48 = vsel %vm793_vm0, %v730_v43, 0.0 }
 0x23a   : > { %v2427_v45 = vpack.c.bf16 %v1552_v44, %v1551_v42  ;;  %v733_v46 = vpop.f32.mrb[3].mxu0  ;;  %v834_v54 = vmul.f32 %v1552_v44, %v1552_v44  ;;  %v850_v58 = vsel %vm793_vm0, %v833_v9, 0.0  ;;  %v799_v59 = vsel %vm793_vm0, %v1552_v44, 0.0 }
 0x23b   : > { %v795_v32 = vsel %vm793_vm0, %v733_v46, 0.0  ;;  %v832_v49 = vmul.f32 %v733_v46, %v733_v46  ;;  %v2431_v50 = vpack.c.bf16 %v733_v46, %v730_v43  ;;  %v847_v53 = vsel %vm793_vm0, %v831_v4, 0.0 }
 0x23c   : > { %v796_v51 = vadd.f32 %v795_v32, %v794_v48  ;;  %v852_v1 = vsel %vm793_vm0, %v834_v54, 0.0 }
 0x23d   : > { %v848_v55 = vsel %vm793_vm0, %v832_v49, 0.0  ;;  %1565 = vmatprep.subr.bf16.mxu1 %v2431_v50  ;;  %1585 = vmatprep.subr.bf16.mxu0 %v2431_v50 }
 0x23e   : > { %v798_v56 = vadd.f32 %v797_v52, %v796_v51  ;;  %v849_v57 = vadd.f32 %v848_v55, %v847_v53  ;;  %1566 = vmatpush3.bf16.msra.mxu1 %v2431_v50  ;;  %1586 = vmatpush3.bf16.msra.mxu0 %v2431_v50 }
 0x23f   : > { %v1555_v60 = vpop.f32.mrb[4].mxu0  ;;  %1567 = vmatprep.subr.bf16.mxu1 %v2427_v45  ;;  %1587 = vmatprep.subr.bf16.mxu0 %v2427_v45 }
 0x240   : > { %v851_v61 = vadd.f32 %v850_v58, %v849_v57  ;;  %v746_v62 = vpop.f32.mrb[5].mxu0  ;;  %v800_v63 = vadd.f32 %v799_v59, %v798_v56  ;;  %v837_v11 = vmul.f32 %v1555_v60, %v1555_v60  ;;  %v805_v19 = vsel %vm793_vm0, %v1555_v60, 0.0 }
 0x241   : > { %v801_v3 = vsel %vm793_vm0, %v746_v62, 0.0  ;;  %v835_v5 = vmul.f32 %v746_v62, %v746_v62  ;;  %v1556_v6 = vpop.f32.mrb[6].mxu0 }
 0x242   : > { %v802_v7 = vadd.f32 %v801_v3, %v800_v63  ;;  %v853_v8 = vadd.f32 %v852_v1, %v851_v61  ;;  %v749_v10 = vpop.f32.mrb[7].mxu0  ;;  %1568 = vmatpush3.bf16.msra.mxu1 %v2427_v45  ;;  %1588 = vmatpush3.bf16.msra.mxu0 %v2427_v45  ;;  %v2449_v13 = vpack.c.bf16 %v1556_v6, %v1555_v60  ;;  %v807_v22 = vsel %vm793_vm0, %v1556_v6, 0.0 }
 0x243   : > { %v854_v12 = vsel %vm793_vm0, %v835_v5, 0.0  ;;  %v803_v14 = vsel %vm793_vm0, %v749_v10, 0.0  ;;  %v836_v18 = vmul.f32 %v749_v10, %v749_v10  ;;  %v2452_v0 = vpack.c.bf16 %v749_v10, %v746_v62 }
 0x244   : > { %v855_v15 = vadd.f32 %v854_v12, %v853_v8  ;;  %v804_v17 = vadd.f32 %v803_v14, %v802_v7  ;;  %v838_v20 = vmul.f32 %v1556_v6, %v1556_v6  ;;  %v858_v24 = vsel %vm793_vm0, %v837_v11, 0.0 }
 0x245   : > { %v856_v21 = vsel %vm793_vm0, %v836_v18, 0.0  ;;  %1569 = vmatprep.subr.bf16.mxu1 %v2452_v0  ;;  %1589 = vmatprep.subr.bf16.mxu0 %v2452_v0 }
 0x246   : > { %v806_v2 = vadd.f32 %v805_v19, %v804_v17  ;;  %v857_v16 = vadd.f32 %v856_v21, %v855_v15  ;;  %1570 = vmatpush3.bf16.msra.mxu1 %v2452_v0  ;;  %1590 = vmatpush3.bf16.msra.mxu0 %v2452_v0  ;;  %v860_v36 = vsel %vm793_vm0, %v838_v20, 0.0 }
 0x247   : > { %v1559_v23 = vpop.f32.mrb[8].mxu0  ;;  %1571 = vmatprep.subr.bf16.mxu1 %v2449_v13  ;;  %1591 = vmatprep.subr.bf16.mxu0 %v2449_v13 }
 0x248   : > { %v762_v26 = vpop.f32.mrb[9].mxu0  ;;  %v808_v27 = vadd.f32 %v807_v22, %v806_v2  ;;  %v859_v31 = vadd.f32 %v858_v24, %v857_v16  ;;  %v841_v44 = vmul.f32 %v1559_v23, %v1559_v23  ;;  %v813_v32 = vsel %vm793_vm0, %v1559_v23, 0.0 }
 0x249   : > { %v809_v30 = vsel %vm793_vm0, %v762_v26, 0.0  ;;  %v839_v33 = vmul.f32 %v762_v26, %v762_v26  ;;  %v1560_v34 = vpop.f32.mrb[10].mxu0 }
 0x24a   : > { %v810_v35 = vadd.f32 %v809_v30, %v808_v27  ;;  %v765_v37 = vpop.f32.mrb[11].mxu0  ;;  %v861_v38 = vadd.f32 %v860_v36, %v859_v31  ;;  %v2467_v43 = vpack.c.bf16 %v1560_v34, %v1559_v23  ;;  %1572 = vmatpush3.bf16.msra.mxu1 %v2449_v13  ;;  %1592 = vmatpush3.bf16.msra.mxu0 %v2449_v13  ;;  %v815_v54 = vsel %vm793_vm0, %v1560_v34, 0.0 }
 0x24b   : > { %v862_v42 = vsel %vm793_vm0, %v839_v33, 0.0  ;;  %v811_v4 = vsel %vm793_vm0, %v765_v37, 0.0  ;;  %v840_v46 = vmul.f32 %v765_v37, %v765_v37  ;;  %v2472_v48 = vpack.c.bf16 %v765_v37, %v762_v26 }
 0x24c   : > { %v812_v9 = vadd.f32 %v811_v4, %v810_v35  ;;  %v863_v49 = vadd.f32 %v862_v42, %v861_v38  ;;  %v842_v51 = vmul.f32 %v1560_v34, %v1560_v34  ;;  %v866_v57 = vsel %vm793_vm0, %v841_v44, 0.0 }
 0x24d   : > { %v864_v53 = vsel %vm793_vm0, %v840_v46, 0.0  ;;  %1573 = vmatprep.subr.bf16.mxu1 %v2472_v48  ;;  %1593 = vmatprep.subr.bf16.mxu0 %v2472_v48 }
 0x24e   : > { %v814_v52 = vadd.f32 %v813_v32, %v812_v9  ;;  %v865_v55 = vadd.f32 %v864_v53, %v863_v49  ;;  %1574 = vmatpush3.bf16.msra.mxu1 %v2472_v48  ;;  %1594 = vmatpush3.bf16.msra.mxu0 %v2472_v48  ;;  %v868_v1 = vsel %vm793_vm0, %v842_v51, 0.0 }
 0x24f   : > { %v1563_v56 = vpop.f32.mrb[12].mxu0  ;;  %1575 = vmatprep.subr.bf16.mxu1 %v2467_v43  ;;  %1595 = vmatprep.subr.bf16.mxu0 %v2467_v43 }
 0x250   : > { %v778_v58 = vpop.f32.mrb[13].mxu0  ;;  %v816_v59 = vadd.f32 %v815_v54, %v814_v52  ;;  %v867_v60 = vadd.f32 %v866_v57, %v865_v55  ;;  %v845_v11 = vmul.f32 %v1563_v56, %v1563_v56  ;;  %v821_v17 = vsel %vm793_vm0, %v1563_v56, 0.0 }
 0x251   : > { %v817_v61 = vsel %vm793_vm0, %v778_v58, 0.0  ;;  %v843_v62 = vmul.f32 %v778_v58, %v778_v58  ;;  %v1564_v63 = vpop.f32.mrb[14].mxu0 }
 0x252   : > { %v818_v3 = vadd.f32 %v817_v61, %v816_v59  ;;  %v781_v5 = vpop.f32.mrb[15].mxu0  ;;  %v869_v6 = vadd.f32 %v868_v1, %v867_v60  ;;  %v2487_v8 = vpack.c.bf16 %v1564_v63, %v1563_v56  ;;  %1576 = vmatpush3.bf16.msra.mxu1 %v2467_v43  ;;  %1596 = vmatpush3.bf16.msra.mxu0 %v2467_v43  ;;  %v823_v21 = vsel %vm793_vm0, %v1564_v63, 0.0 }
 0x253   : > { %v870_v7 = vsel %vm793_vm0, %v843_v62, 0.0  ;;  %v819_v10 = vsel %vm793_vm0, %v781_v5, 0.0  ;;  %v844_v14 = vmul.f32 %v781_v5, %v781_v5  ;;  %v2492_v15 = vpack.c.bf16 %v781_v5, %v778_v58 }
 0x254   : > { %v820_v12 = vadd.f32 %v819_v10, %v818_v3  ;;  %v871_v18 = vadd.f32 %v870_v7, %v869_v6  ;;  %v846_v19 = vmul.f32 %v1564_v63, %v1564_v63  ;;  %v874_v16 = vsel %vm793_vm0, %v845_v11, 0.0 }
 0x255   : > { %v872_v2 = vsel %vm793_vm0, %v844_v14, 0.0  ;;  %1577 = vmatprep.subr.bf16.mxu1 %v2492_v15  ;;  %1597 = vmatprep.subr.bf16.mxu0 %v2492_v15 }
 0x256   : > { %v822_v20 = vadd.f32 %v821_v17, %v820_v12  ;;  %v873_v22 = vadd.f32 %v872_v2, %v871_v18  ;;  %1578 = vmatpush3.bf16.msra.mxu1 %v2492_v15  ;;  %1598 = vmatpush3.bf16.msra.mxu0 %v2492_v15  ;;  %v876_v26 = vsel %vm793_vm0, %v846_v19, 0.0 }
 0x257   : > { %1579 = vmatprep.subr.bf16.mxu1 %v2487_v8  ;;  %1599 = vmatprep.subr.bf16.mxu0 %v2487_v8 }
 0x258   : > { %v824_v23 = vadd.f32 %v823_v21, %v822_v20  ;;  %v875_v24 = vadd.f32 %v874_v16, %v873_v22 }
 0x25a   : > { %v825_v27 = vrot.slane %v824_v23, 4  ;;  %v877_v31 = vadd.f32 %v876_v26, %v875_v24  ;;  %1580 = vmatpush3.bf16.msra.mxu1 %v2487_v8  ;;  %1600 = vmatpush3.bf16.msra.mxu0 %v2487_v8 }
 0x25b   : > { %1605 = vmatprep.subr.bf16.mxu1 %v2431_v50  ;;  %1625 = vmatprep.subr.bf16.mxu0 %v2431_v50 }
 0x25c   : > { %v826_v30 = vadd.f32 %v825_v27, %v824_v23  ;;  %v878_v33 = vrot.slane %v877_v31, 4 }
 0x25d   : > { %1582 = vmatmul.mubr.msk.bf16.vlgmr.msra.gmra.mrb[0].mxu1 %vm2403_vm2, %v2009_v25  ;;  %1602 = vmatmul.mubr.msk.bf16.vlgmr.msra.gmra.mrb[16].mxu0 %vm2407_vm3, %v2009_v25  ;;  %vm886_vm2 = vcmask 254976  }
 0x25e   : > { %v827_v34 = vrot.slane %v826_v30, 2  ;;  %v879_v36 = vadd.f32 %v878_v33, %v877_v31  ;;  %1606 = vmatpush3.bf16.msra.mxu1 %v2431_v50  ;;  %1626 = vmatpush3.bf16.msra.mxu0 %v2431_v50 }
 0x25f   : > { %1607 = vmatprep.subr.bf16.mxu1 %v2427_v45  ;;  %1627 = vmatprep.subr.bf16.mxu0 %v2427_v45 }
 0x260   : > { %v828_v35 = vadd.f32 %v827_v34, %v826_v30  ;;  %v880_v37 = vrot.slane %v879_v36, 2  ;;  %1621 = vmatprep.mubr.msk.bf16.mxu1 %vm2411_vm6, %v2009_v25  ;;  %1641 = vmatprep.mubr.msk.bf16.mxu0 %vm2419_vm14, %v2009_v25 }
 0x262   : > { %v829_v28 = vrot.slane %v828_v35, 1  ;;  %v881_v29 = vadd.f32 %v880_v37, %v879_v36  ;;  %1608 = vmatpush3.bf16.msra.mxu1 %v2427_v45  ;;  %1628 = vmatpush3.bf16.msra.mxu0 %v2427_v45 }
 0x263   : > { %1609 = vmatprep.subr.bf16.mxu1 %v2452_v0  ;;  %1629 = vmatprep.subr.bf16.mxu0 %v2452_v0 }
 0x264   : > { %v882_v50 = vrot.slane %v881_v29, 1  ;;  %v830_v39 = vadd.f32 %v829_v28, %v828_v35 }
 0x266   : > { %1610 = vmatpush3.bf16.msra.mxu1 %v2452_v0  ;;  %1630 = vmatpush3.bf16.msra.mxu0 %v2452_v0  ;;  %v883_v40 = vadd.f32 %v882_v50, %v881_v29 }
 0x267   : > { %1611 = vmatprep.subr.bf16.mxu1 %v2449_v13  ;;  %1631 = vmatprep.subr.bf16.mxu0 %v2449_v13 }
 0x268   : > { %v885_v38 = vsel %vm884_vm1, %v830_v39, %v883_v40 }
 0x269   : > { %887 = vst.msk [vmem:[%s2534_s29] sm:$0x3] %vm886_vm2, %v885_v38 }
 0x26a   : > { %1612 = vmatpush3.bf16.msra.mxu1 %v2449_v13  ;;  %1632 = vmatpush3.bf16.msra.mxu0 %v2449_v13 }
 0x26b   : > { %1613 = vmatprep.subr.bf16.mxu1 %v2472_v48  ;;  %1633 = vmatprep.subr.bf16.mxu0 %v2472_v48 }
 0x26e   : > { %1614 = vmatpush3.bf16.msra.mxu1 %v2472_v48  ;;  %1634 = vmatpush3.bf16.msra.mxu0 %v2472_v48 }
 0x26f   : > { %1615 = vmatprep.subr.bf16.mxu1 %v2467_v43  ;;  %1635 = vmatprep.subr.bf16.mxu0 %v2467_v43 }
 0x272   : > { %1616 = vmatpush3.bf16.msra.mxu1 %v2467_v43  ;;  %1636 = vmatpush3.bf16.msra.mxu0 %v2467_v43 }
 0x273   : > { %1617 = vmatprep.subr.bf16.mxu1 %v2492_v15  ;;  %1637 = vmatprep.subr.bf16.mxu0 %v2492_v15 }
 0x276   : > { %1618 = vmatpush3.bf16.msra.mxu1 %v2492_v15  ;;  %1638 = vmatpush3.bf16.msra.mxu0 %v2492_v15 }
 0x277   : > { %1619 = vmatprep.subr.bf16.mxu1 %v2487_v8  ;;  %1639 = vmatprep.subr.bf16.mxu0 %v2487_v8 }
 0x27a   : > { %1620 = vmatpush3.bf16.msra.mxu1 %v2487_v8  ;;  %1640 = vmatpush3.bf16.msra.mxu0 %v2487_v8 }
 0x27d   : > { %1622 = vmatmul.mubr.msk.bf16.vlgmr.msra.gmra.mrb[4].mxu1 %vm2415_vm11, %v2009_v25  ;;  %1642 = vmatmul.mubr.msk.bf16.vlgmr.msra.gmra.mrb[20].mxu0 %vm2423_vm15, %v2009_v25 }
 0x330   : > { %v2561_v45 = vpop.f32.mrb[0].mxu1  ;;  %v1603_v13 = vpop.f32.mrb[16].mxu0 }
 0x331   : > { %v2563_v0 = vpop.f32.mrb[1].mxu1  ;;  %v1014_v42 = vpop.f32.mrb[17].mxu0 }
 0x332   : > { %v2565_v43 = vpop.f32.mrb[2].mxu1  ;;  %v1604_v4 = vpop.f32.mrb[18].mxu0 }
 0x333   : > { %v1754_v44 = vpack.i.bf16 %v1604_v4, %v1603_v13  ;;  %v2567_v9 = vpop.f32.mrb[3].mxu1  ;;  %v1017_v47 = vpop.f32.mrb[19].mxu0 }
 0x334   : > { %v1759_v46 = vpack.i.bf16 %v1017_v47, %v1014_v42 }
 0x335   : > { %1755 = vrot.lane.b32.xlu1 %v1754_v44, %s2010_s8 }
 0x336   : > { %1760 = vrot.lane.b32.xlu0 %v1759_v46, %s2010_s8 }
 0x350   : > { %v1623_v25 = vpop.f32.mrb[4].mxu1  ;;  %v1643_v41 = vpop.f32.mrb[20].mxu0 }
 0x351   : > { %v1077_v48 = vpop.f32.mrb[5].mxu1  ;;  %v1140_v32 = vpop.f32.mrb[21].mxu0 }
 0x352   : > { %v1624_v49 = vpop.f32.mrb[6].mxu1  ;;  %v1644_v51 = vpop.f32.mrb[22].mxu0 }
 0x353   : > { %v1764_v52 = vpack.i.bf16 %v1624_v49, %v1623_v25  ;;  %v1080_v53 = vpop.f32.mrb[7].mxu1  ;;  %v1779_v54 = vpack.i.bf16 %v1644_v51, %v1643_v41  ;;  %v1143_v55 = vpop.f32.mrb[23].mxu0 }
 0x354   : > { %v1769_v56 = vpack.i.bf16 %v1080_v53, %v1077_v48  ;;  %v1774_v57 = vpack.i.bf16 %v1143_v55, %v1140_v32 }
 0x355   : > { %1765 = vrot.lane.b32.xlu1 %v1764_v52, %s2011_s20 }
 0x356   : > { %1770 = vrot.lane.b32.xlu0 %v1769_v56, %s2011_s20 }
 0x357   : > { %1878 = shalt.err (!%p1875_p7)
}
 0x358   : > { %s1879_s27 = scalar_lea.hbm %s2574_s21, 32  ;;  %s1883_s4 = scalar_lea.hbm %s2687_s3, 128 }
 0x359   : > { %p1880_p1 = scmp.ne.s32.totalorder %s2574_s21, %s1879_s27  ;;  %p1884_p5 = scmp.lt.u32.totalorder %s2574_s21, %s2687_s3 }
 0x35a   : > { %p1885_p9 = scmp.lt.u32.totalorder %s1883_s4, %s1879_s27  ;;  %p1887_p6 = scmp.lt.u32.totalorder %s1879_s27, %s2574_s21 }
 0x35b   : > { %p1881_p2 = pnand %p1880_p1, %p2143_p11 }
 0x35c   : > { %p1886_p0 = por %p1885_p9, %p1884_p5 }
 0x35d   : > { %p1882_p4 = pneg %p1881_p2 }
 0x35e   : > { %p1888_p8 = por %p1887_p6, %p1886_p0 }
 0x360   : > { %p1889_p10 = pnand %p1888_p8, %p1882_p4 }
 0x362   : > { %1892 = shalt.err (!%p1889_p10)
}
 0x363   : > { %1657 = dma.vmem_to_hbm [thread:$0]  (%p2143_p11), %s2578_s9, 32, %s2574_s21, %s1243_s17   ;;  %vm1207_vm3 = vcmask 523264   ;;  %vm1212_vm4 = vcmask 785408  }
 0x364   : > { %s2013_s7 = smov 96   ;;  %s1415_s10 = sshll.u32 %s2203_s11, 4 }
 0x365   : > { %1780 = vrot.lane.b32.xlu1 %v1779_v54, %s2013_s7  ;;  %1775 = vrot.lane.b32.xlu0 %v1774_v57, %s2013_s7  ;;  %s1470_s30 = sshll.u32 %s1983_s15, 2  ;;  %s1471_s1 = sshll.u32 %s1987_s16, 3 }
 0x366   : > { %s1255_s21 = sadd.s32 %s1471_s1, %s1470_s30  ;;  %s227_s15 = scalar_lea.vmem [#allocation7], %s1415_s10 }
 0x367   : > { %s1258_s16 = sshll.u32 %s227_s15, 4  ;;  %s1472_s9 = sshll.u32 %s1255_s21, 6  ;;  %s2620_s16 = int_to_ptr.vmem [resolvable:$true] %s1258_s16 }
 0x368   : > { %s2627_s26 = scalar_lea.hbm %s2686_s2, %s1472_s9  ;;  %s1238_s27 = scalar_lea.sflag [#allocation4], %s2203_s11 }
 0x369   : > { %s1893_s29 = scalar_lea.vmem %s2620_s16, 256  ;;  %s2014_s8 = smov [#allocation7]  }
 0x36a   : > { %p1894_p12 = scmp.ne.s32.totalorder %s2620_s16, %s1893_s29  ;;  %s1897_s4 = sshll.u32 %s2014_s8, 4  ;;  %s1898_s4 = int_to_ptr.vmem [resolvable:$false] %s1897_s4 }
 0x36b   : > { %s1899_s5 = scalar_lea.vmem %s1898_s4, 512  ;;  %p1900_p7 = scmp.lt.s32.totalorder %s2620_s16, %s1898_s4 }
 0x36c   : > { %p1895_p13 = pnand %p1894_p12, %p2143_p11  ;;  %p1901_p1 = scmp.lt.s32.totalorder %s1899_s5, %s1893_s29 }
 0x36e   : > { %p1896_p3 = pneg %p1895_p13  ;;  %p1902_p2 = por %p1901_p1, %p1900_p7 }
 0x370   : > { %p1903_p4 = pnand %p1902_p2, %p1896_p3 }
 0x3a7   : > { %v1756_v58 = vpop.permute.xlu1 %1755 }
 0x3a8   : > { %v1761_v59 = vpop.permute.xlu0 %1760  ;;  %v1758_v60 = vunpack.i.h.bf16 %v1756_v58  ;;  %v1757_v61 = vunpack.i.l.bf16 %v1756_v58 }
 0x3a9   : > { %v1763_v63 = vunpack.i.h.bf16 %v1761_v59  ;;  %v1762_v1 = vunpack.i.l.bf16 %v1761_v59 }
 0x3aa   : > { %v1205_v10 = vsel %vm793_vm0, %v2561_v45, %v1757_v61  ;;  %v1206_v11 = vsel %vm793_vm0, %v2565_v43, %v1758_v60 }
 0x3ab   : > { %v1203_v14 = vsel %vm793_vm0, %v2563_v0, %v1762_v1  ;;  %v1204_v15 = vsel %vm793_vm0, %v2567_v9, %v1763_v63 }
 0x3c7   : > { %v1766_v62 = vpop.permute.xlu1 %1765 }
 0x3c8   : > { %v1771_v3 = vpop.permute.xlu0 %1770  ;;  %v1768_v5 = vunpack.i.h.bf16 %v1766_v62  ;;  %v1767_v6 = vunpack.i.l.bf16 %v1766_v62 }
 0x3c9   : > { %v1773_v7 = vunpack.i.h.bf16 %v1771_v3  ;;  %v1772_v8 = vunpack.i.l.bf16 %v1771_v3 }
 0x3ca   : > { %v1211_v20 = vsel %vm1207_vm3, %v1206_v11, %v1768_v5  ;;  %v1210_v2 = vsel %vm1207_vm3, %v1205_v10, %v1767_v6 }
 0x3cb   : > { %v1209_v16 = vsel %vm1207_vm3, %v1204_v15, %v1773_v7  ;;  %v1208_v23 = vsel %vm1207_vm3, %v1203_v14, %v1772_v8 }
 0x3d7   : > { %v1781_v12 = vpop.permute.xlu1 %1780  ;;  %v1776_v19 = vpop.permute.xlu0 %1775 }
 0x3d8   : > { %v1783_v17 = vunpack.i.h.bf16 %v1781_v12  ;;  %v1782_v18 = vunpack.i.l.bf16 %v1781_v12  ;;  %v1778_v21 = vunpack.i.h.bf16 %v1776_v19  ;;  %v1777_v22 = vunpack.i.l.bf16 %v1776_v19 }
 0x3da   : > { %v1215_v24 = vsel %vm1212_vm4, %v1210_v2, %v1782_v18  ;;  %v1216_v26 = vsel %vm1212_vm4, %v1211_v20, %v1783_v17  ;;  %v1213_v31 = vsel %vm1212_vm4, %v1208_v23, %v1777_v22  ;;  %v1214_v30 = vsel %vm1212_vm4, %v1209_v16, %v1778_v21 }
 0x3db   : > { %v1489_v27 = vpack.c.bf16 %v1216_v26, %v1215_v24  ;;  %v1484_v33 = vpack.c.bf16 %v1214_v30, %v1213_v31 }
 0x3dd   : > { %1491 = vst [vmem:[%s227_s15 + $0x8] sm:$0xff] %v1489_v27   ;;  %1485 = vst [vmem:[%s227_s15] sm:$0xff] %v1484_v33  }
 0x3de   : > { %1906 = shalt.err (!%p1903_p4)
}
 0x3df   : > { %s1907_s28 = scalar_lea.hbm %s2627_s26, 256  ;;  %s1911_s30 = scalar_lea.hbm %s2686_s2, 1024 }
 0x3e0   : > { %p1908_p5 = scmp.ne.s32.totalorder %s2627_s26, %s1907_s28  ;;  %p1912_p6 = scmp.lt.u32.totalorder %s2627_s26, %s2686_s2 }
 0x3e1   : > { %p1913_p8 = scmp.lt.u32.totalorder %s1911_s30, %s1907_s28  ;;  %p1915_p12 = scmp.lt.u32.totalorder %s1907_s28, %s2627_s26 }
 0x3e2   : > { %p1909_p9 = pnand %p1908_p5, %p2143_p11 }
 0x3e3   : > { %p1914_p10 = por %p1913_p8, %p1912_p6 }
 0x3e4   : > { %p1910_p0 = pneg %p1909_p9 }
 0x3e5   : > { %p1916_p13 = por %p1915_p12, %p1914_p10 }
 0x3e7   : > { %p1917_p3 = pnand %p1916_p13, %p1910_p0 }
 0x3e9   : > { %1920 = shalt.err (!%p1917_p3)
}
 0x3ea   : > { %1656 = dma.vmem_to_hbm [thread:$0]  (%p2143_p11), %s2620_s16, 256, %s2627_s26, %s1238_s27, %s2011_s20, %s2011_s20, %s2006_s22  }
 0x3eb PF: > { %p1678_p7 = scmp.ge.s32.totalorder %s1999_s19, 2  ;;  %s1288_s15 = sand.u32 1, %s1971_s12  }
 0x3ec   : > { %p2728_p1 = scmp.ne.s32.totalorder %s2702_s25, 0  ;;  %s1289_s9 = scalar_lea.sflag [#allocation4], %s1288_s15 }
 0x3ee   : > { %p1669_p2 = pnand %p1678_p7, %p2728_p1 }
 0x3f0   : > { %1962 = dma.done.wait (!%p1669_p2), %s1289_s9, 256  }
 0x3f1   : > { %1964 = vsyncadd (!%p1669_p2), %s1289_s9, 4294967040  ;;  %s1298_s6 = scalar_lea.sflag [#allocation9], %s1288_s15 }
 0x3f2   : > { %1966 = dma.done.wait (!%p1669_p2), %s1298_s6, 32  }
 0x3f3   : > { %1968 = vsyncadd (!%p1669_p2), %s1298_s6, 4294967264  ;;  %s24_s19 = sadd.s32 1, %s1999_s19   ;;  %s2729_s15 = sld [smem:[#allocation14_spill]] }
 0x3f4   : > { %p21_p4 = scmp.ge.s32.totalorder %s24_s19, 6   ;;  %s2730_s17 = sld [smem:[#allocation15_spill]] }
 0x3f5   : > { %s2731_s11 = sld [smem:[#allocation16_spill]]  ;;  %s2732_s12 = smov %s1975_s13 }
 0x3f6   : > { %s2733_s13 = smov %s1979_s14  ;;  %s2734_s14 = smov %s2160_s23 }
 0x3f7   : > { %s2735_s16 = smov %s1995_s18  ;;  %23 = sbr.rel (!%p21_p4) target bundleno = 12 (0xc), region = 94 }
 0x3fb   : > { %s2736_s18 = smov %s2731_s11 }
 0x3fe   :  { %1303 = vsyncpa [#allocation3], 1 }
 0x3ff   :  { %1305 = vsyncpa [#allocation3 + $0x1], 1 }
 0x400   :  { %1306 = vsyncpa [#allocation6], 1 }
 0x401   :  { %1307 = vsyncpa [#allocation4], 1 }
 0x402   :  { %1309 = vsyncpa [#allocation4 + $0x1], 1 }
 0x403   :  { %1310 = vsyncpa [#allocation9], 1 }
 0x404   :  { %1312 = vsyncpa [#allocation9 + $0x1], 1 }

</bundles_post_ra>
